<compile_context>
chip_gen: v6e
topology: v6e:2x2x1
jax: 0.10.0
libtpu: 0.0.40
codegen_flags: <defaults>
</compile_context>

<pallas_src>
import functools

import jax
import jax.numpy as jnp
from jax.experimental import pallas as pl
from jax.experimental.pallas import tpu as pltpu


def _ae_kernel_2mm(x_ref, w_ref, b_ref, o_ref):
    """relu((x @ W) contracted-back-against W + b), no transpose materialized."""
    x = x_ref[...]                                   # [TB, D] f32
    w = w_ref[...]                                   # [D, H]  f32
    # encode: [TB, D] x [D, H] -> [TB, H]
    h = jax.lax.dot_general(
        x, w, (((1,), (0,)), ((), ())), preferred_element_type=jnp.float32)
    # decode: contract h's H axis against w's H axis -> [TB, D]
    # (equivalent to h @ w.T but lets the MXU do the transposed contraction,
    #  avoiding an XLU transpose and an [H, D] temp in VMEM)
    out = jax.lax.dot_general(
        h, w, (((1,), (1,)), ((), ())), preferred_element_type=jnp.float32)
    out = out + b_ref[...]                           # broadcast (1, D) over rows
    o_ref[...] = jnp.maximum(out, 0.0).astype(o_ref.dtype)


def _ae_kernel_fused(x_ref, m_ref, b_ref, o_ref):
    """relu(x @ M + b) with M = W @ W.T precomputed outside the kernel."""
    out = jax.lax.dot_general(
        x_ref[...], m_ref[...], (((1,), (0,)), ((), ())),
        preferred_element_type=jnp.float32)          # [TB, D]
    out = out + b_ref[...]
    o_ref[...] = jnp.maximum(out, 0.0).astype(o_ref.dtype)


def toy_superposition_ae_forward(x, enc_w, dec_b, *, block_b=None,
                                 fuse_weights=False):
    """x: [B, D], enc_w: [D, H], dec_b: [D] -> [B, D] (f32)."""
    B, D = x.shape
    H = enc_w.shape[1]
    x = x.astype(jnp.float32)
    dec_b2 = dec_b.reshape(1, D).astype(jnp.float32)

    # ---- batch tile: biggest reasonable row tile, sublane (8) aligned. ----
    if block_b is None:
        block_b = min(1024, max(8, B))
    block_b = max(8, (block_b // 8) * 8)

    # Pad batch to a multiple of the row tile so every grid step is full.
    num_blocks = pl.cdiv(B, block_b)
    Bp = num_blocks * block_b
    if Bp != B:
        x = jnp.pad(x, ((0, Bp - B), (0, 0)))
    grid = (num_blocks,)

    if fuse_weights:
        # Weight-only pre-fusion: one [D, D] matmul per tile instead of two
        # skinny ones through an H-wide intermediate. Win when H << D.
        w_arg = jnp.dot(enc_w.astype(jnp.float32), enc_w.T.astype(jnp.float32),
                        preferred_element_type=jnp.float32)        # [D, D]
        kernel = _ae_kernel_fused
        w_spec = pl.BlockSpec((D, D), lambda i: (0, 0))             # resident
    else:
        w_arg = enc_w.astype(jnp.float32)
        kernel = _ae_kernel_2mm
        w_spec = pl.BlockSpec((D, H), lambda i: (0, 0))             # resident

    out = pl.pallas_call(
        kernel,
        out_shape=jax.ShapeDtypeStruct((Bp, D), jnp.float32),
        grid=grid,
        in_specs=[
            pl.BlockSpec((block_b, D), lambda i: (i, 0)),           # x: streamed
            w_spec,                                                 # W / M: resident
            pl.BlockSpec((1, D), lambda i: (0, 0)),                 # bias: resident
        ],
        out_specs=pl.BlockSpec((block_b, D), lambda i: (i, 0)),
        compiler_params=pltpu.CompilerParams(
            # Batch axis is embarrassingly parallel -> shard across the 2
            # TensorCores on v7x (harmless single-TC no-op on v5e/v6e).
            dimension_semantics=("parallel",),
        ),
    )(x, w_arg, dec_b2)

    return out[:B] if Bp != B else out


def init_params(key, input_dim, hidden_dim):
    # xavier_normal_ on [input_dim, hidden_dim]: std = sqrt(2 / (fan_in + fan_out))
    std = (2.0 / (input_dim + hidden_dim)) ** 0.5
    enc_w = std * jax.random.normal(key, (input_dim, hidden_dim), dtype=jnp.float32)
    dec_b = jnp.zeros((input_dim,), dtype=jnp.float32)  # nn.Parameter(torch.zeros(input_dim))
    return enc_w, dec_b


def _reference(x, enc_w, dec_b):
    h = x @ enc_w
    return jnp.maximum(h @ enc_w.T + dec_b, 0.0)


if __name__ == "__main__":
    INPUT_DIM, HIDDEN_DIM = 16, 4

    key = jax.random.PRNGKey(0)
    k_x, k_w, k_x2 = jax.random.split(key, 3)
    enc_w, dec_b = init_params(k_w, INPUT_DIM, HIDDEN_DIM)

    # --- small, single-tile case (matches the toy module sizes) ---
    B = 8
    x = jax.random.normal(k_x, (B, INPUT_DIM), dtype=jnp.float32)
    ref = _reference(x, enc_w, dec_b)

    out = jax.block_until_ready(toy_superposition_ae_forward(x, enc_w, dec_b))
    assert out.shape == (B, INPUT_DIM)
    assert jnp.allclose(out, ref, atol=1e-5, rtol=1e-5)

    out_fused = jax.block_until_ready(
        toy_superposition_ae_forward(x, enc_w, dec_b, fuse_weights=True))
    assert jnp.allclose(out_fused, ref, atol=1e-5, rtol=1e-5)

    # --- batched/streamed case: non-divisible batch exercises padding + grid ---
    B2, TB = 137, 64
    x2 = jax.random.normal(k_x2, (B2, INPUT_DIM), dtype=jnp.float32)
    ref2 = _reference(x2, enc_w, dec_b)

    out2 = jax.block_until_ready(
        toy_superposition_ae_forward(x2, enc_w, dec_b, block_b=TB))
    assert out2.shape == (B2, INPUT_DIM)
    assert jnp.allclose(out2, ref2, atol=1e-5, rtol=1e-5)

    out2_fused = jax.block_until_ready(
        toy_superposition_ae_forward(x2, enc_w, dec_b, block_b=TB,
                                     fuse_weights=True))
    assert jnp.allclose(out2_fused, ref2, atol=1e-5, rtol=1e-5)

    print("KERNEL_OK")
</pallas_src>

<mosaic_0001>
module attributes {stable_mosaic.version = 11 : i64} {
  func.func @_ae_kernel_2mm(%arg0: i32, %arg1: memref<8x16xf32, #tpu.memory_space<vmem>>, %arg2: memref<16x4xf32, #tpu.memory_space<vmem>>, %arg3: memref<1x16xf32, #tpu.memory_space<vmem>>, %arg4: memref<8x16xf32, #tpu.memory_space<vmem>>) attributes {dimension_semantics = [#tpu.dimension_semantics<parallel>], iteration_bounds = array<i64: 1>, scalar_prefetch = 0 : i64, scratch_operands = 0 : i64, tpu.core_type = #tpu.core_type<tc>, window_params = [{transform_indices = @transform_0, window_bounds = array<i64: 8, 16>}, {pipeline_mode = #tpu.pipeline_mode<synchronous>, transform_indices = @transform_1, window_bounds = array<i64: 16, 4>}, {pipeline_mode = #tpu.pipeline_mode<synchronous>, transform_indices = @transform_2, window_bounds = array<i64: 1, 16>}, {transform_indices = @transform_3, window_bounds = array<i64: 8, 16>}]} {
    %c0 = arith.constant 0 : index
    %c0_0 = arith.constant 0 : index
    %0 = vector.load %arg1[%c0, %c0_0] : memref<8x16xf32, #tpu.memory_space<vmem>>, vector<8x16xf32>
    %c0_1 = arith.constant 0 : index
    %c0_2 = arith.constant 0 : index
    %1 = vector.load %arg2[%c0_1, %c0_2] : memref<16x4xf32, #tpu.memory_space<vmem>>, vector<16x4xf32>
    %cst = arith.constant dense<0.000000e+00> : vector<8x4xf32>
    %2 = tpu.matmul %0, %1, %cst {dimension_numbers = #tpu.dot_dimension_numbers<[1], [0], [0], [1], [0, 0, 1, 1], [], []>} : vector<8x16xf32>, vector<16x4xf32>, vector<8x4xf32> -> vector<8x4xf32>
    %cst_3 = arith.constant dense<0.000000e+00> : vector<8x16xf32>
    %3 = tpu.matmul %2, %1, %cst_3 {dimension_numbers = #tpu.dot_dimension_numbers<[1], [1], [0], [0], [0, 0, 1, 0], [], []>} : vector<8x4xf32>, vector<16x4xf32>, vector<8x16xf32> -> vector<8x16xf32>
    %c0_4 = arith.constant 0 : index
    %c0_5 = arith.constant 0 : index
    %4 = vector.load %arg3[%c0_4, %c0_5] : memref<1x16xf32, #tpu.memory_space<vmem>>, vector<1x16xf32>
    %5 = vector.broadcast %4 : vector<1x16xf32> to vector<8x16xf32>
    %6 = arith.addf %3, %5 : vector<8x16xf32>
    %cst_6 = arith.constant 0.000000e+00 : f32
    %7 = vector.broadcast %cst_6 : f32 to vector<8x16xf32>
    %8 = arith.maximumf %6, %7 : vector<8x16xf32>
    %c0_7 = arith.constant 0 : index
    %c0_8 = arith.constant 0 : index
    %9 = vector.load %arg4[%c0_7, %c0_8] : memref<8x16xf32, #tpu.memory_space<vmem>>, vector<8x16xf32>
    tpu.vector_store %arg4[%c0_7, %c0_8], %8 {strides = array<i32>} : memref<8x16xf32, #tpu.memory_space<vmem>>, vector<8x16xf32>,
    return
  }
  func.func @transform_0(%arg0: i32) -> (i32, i32) {
    %c0_i32 = arith.constant 0 : i32
    %c0_i32_0 = arith.constant 0 : i32
    return %arg0, %c0_i32 : i32, i32
  }
  func.func @transform_1(%arg0: i32) -> (i32, i32) {
    %c0_i32 = arith.constant 0 : i32
    %c0_i32_0 = arith.constant 0 : i32
    %c0_i32_1 = arith.constant 0 : i32
    return %c0_i32, %c0_i32_0 : i32, i32
  }
  func.func @transform_2(%arg0: i32) -> (i32, i32) {
    %c0_i32 = arith.constant 0 : i32
    %c0_i32_0 = arith.constant 0 : i32
    %c0_i32_1 = arith.constant 0 : i32
    return %c0_i32, %c0_i32_0 : i32, i32
  }
  func.func @transform_3(%arg0: i32) -> (i32, i32) {
    %c0_i32 = arith.constant 0 : i32
    %c0_i32_0 = arith.constant 0 : i32
    return %arg0, %c0_i32 : i32, i32
  }
}

</mosaic_0001>

<bundles_post_ra>
// kernel: tpu_custom_call.1
= control target key start
LH: loop header
LB: loop body
LE: loop exit
PB: predicated region body
PF: predicated region fallthrough
CT: control target
= control target key end

     0   :  { %v245_v1 = vmov 0.0   ;;  %vm246_vm0 = vmmov 0   ;;  %vm99_vm1 = vcmask 31744   ;;  %s285_s0 = inlined_call_operand.vmem [shape: f32[8,16], index: 0, kind: input, shape index: {}]   ;;  %s286_s1 = inlined_call_operand.vmem [shape: f32[16,4], index: 1, kind: input, shape index: {}]   ;;  %s287_s2 = inlined_call_operand.vmem [shape: f32[1,16], index: 2, kind: input, shape index: {}]   ;;  %s288_s3 = inlined_call_operand.hbm [shape: f32[8,16], index: 3, kind: output, shape index: {}]  }
   0x1   :  { %v17_v0 = vld [vmem:[%s286_s1 + $0x8] sm:$0xff]  ;;  %206 = vmatprep.subr.mxu0 %v245_v1  ;;  %v16_v2 = vld [vmem:[%s286_s1] sm:$0xff]  ;;  %210 = vmatprep.mubr.msk.f32.mxu0 %vm246_vm0, %v245_v1 }
   0x2   :  { %8 = vsyncpa [#allocation3], 0  ;;  %207 = vmatpush3.msra.mxu0 %v17_v0  ;;  %v15_v3 = vld [vmem:[%s285_s0] sm:$0xff]  ;;  %vm18_vm2 = vcmask 130048   ;;  %213 = vmatprep.subr.mxu1 %v245_v1  ;;  %s247_s19 = smov [#allocation2]  }
   0x3   :  { %208 = vmatprep.subr.mxu0 %v245_v1  ;;  %214 = vmatpush3.xpose.msk.msra.mxu1 %vm99_vm1, %v17_v0  ;;  %v196_v6 = vld [vmem:[%s287_s2] ss:$0 sm:$0xff]  ;;  %s187_s0 = sshll.u32 %s247_s19, 4  ;;  %s188_s0 = int_to_ptr.vmem [resolvable:$true] %s187_s0 }
   0x4   :  { %209 = vmatpush3.msra.mxu0 %v16_v2  ;;  %215 = vmatprep.subr.mxu1 %v245_v1  ;;  %s223_s20 = scalar_lea.vmem %s188_s0, 128  ;;  %p228_p1 = scmp.lt.s32.totalorder %s188_s0, %s188_s0 }
   0x5   :  { %211 = vmatmul.mubr.msk.f32.vlgmr.msra.gmra.mxu0 %vm18_vm2, %v15_v3  ;;  %217 = vmatprep.mubr.msk.f32.mxu1 %vm246_vm0, %v245_v1  ;;  %p224_p0 = scmp.ne.s32.totalorder %s188_s0, %s223_s20  ;;  %p229_p2 = scmp.lt.s32.totalorder %s223_s20, %s223_s20 }
   0x7   :  { %216 = vmatpush3.xpose.msk.msra.mxu1 %vm99_vm1, %v16_v2  ;;  %p230_p3 = por %p229_p2, %p228_p1 }
   0x9   :  { %p231_p4 = pnand %p230_p3, %p224_p0 }
  0xc5   :  { %v88_v4 = vpop.f32.mrf.mxu0 }
  0xc6   :  { %218 = vmatmul.mubr.msk.f32.vlgmr.msra.gmra.mxu1 %vm99_vm1, %v88_v4 }
  0xc7   :  { %v212_v5 = vpop.f32.mrf.mxu0 }
 0x186   :  { %v175_v7 = vpop.f32.mrf.mxu1 }
 0x187   :  { %v176_v8 = vadd.f32 %v196_v6, %v175_v7 }
 0x188   :  { %v219_v9 = vpop.f32.mrf.mxu1 }
 0x189   :  { %v179_v10 = vmax.f32 %v176_v8, 0.0 }
 0x18b   :  { %180 = vst.msk [vmem:[#allocation2] sm:$0xff] %vm18_vm2, %v179_v10 }
 0x18c   :  { %234 = shalt.err (!%p231_p4)
}
 0x18d   :  { %190 = dma.vmem_to_hbm [thread:$0]  %s188_s0, 128, %s288_s3, [#allocation3]  }
 0x18e   :  { %243 = dma.done.wait [#allocation3], 128  }
 0x18f   :  { %244 = vsyncadd [#allocation3], 4294967168 }
 0x190   :  { %194 = vsyncpa [#allocation3], 1 }

</bundles_post_ra>
